<compile_context>
chip_gen: v7x
topology: tpu7x:2x2x1
jax: 0.10.0
libtpu: 0.0.40
codegen_flags: <defaults>
</compile_context>

<pallas_src>
import jax
import jax.numpy as jnp
from jax.experimental import pallas as pl
from jax.experimental.pallas import tpu as pltpu

_LANE = 128
_SUBLANE = 8


def _round_up(x, m):
    return (x + m - 1) // m * m


def prepare_params(w_mu, b_mu, w_logvar, b_logvar, compute_dtype=jnp.bfloat16):
    """Fuse/transpose/pad the two Linear layers ONCE (hoisted out of forward).

    w_*: [out_dim, in_dim] (PyTorch layout), b_*: [out_dim].
    Returns (w_fused [in_dim, 2*out_pad] compute_dtype,
             b_fused [1, 2*out_pad] f32,
             out_dim).
    Columns [0:out_dim] -> mu head, [out_pad:out_pad+out_dim] -> logvar head,
    remaining columns are zero (they contribute exactly 0 to the KL sum).
    """
    out_dim, in_dim = w_mu.shape
    out_pad = _round_up(out_dim, _LANE)
    w = jnp.zeros((in_dim, 2 * out_pad), dtype=compute_dtype)
    w = w.at[:, :out_dim].set(jnp.transpose(w_mu).astype(compute_dtype))
    w = w.at[:, out_pad:out_pad + out_dim].set(
        jnp.transpose(w_logvar).astype(compute_dtype))
    b = jnp.zeros((1, 2 * out_pad), dtype=jnp.float32)
    b = b.at[0, :out_dim].set(b_mu.astype(jnp.float32))
    b = b.at[0, out_pad:out_pad + out_dim].set(b_logvar.astype(jnp.float32))
    return w, b, out_dim


def _pick_block_b(batch, in_dim, out_pad, itemsize):
    """Largest batch tile (<=512, multiple of 8) that fits a conservative
    24 MiB VMEM budget (double-buffered x/mu/elv blocks + weight panel),
    safe for v7x's smaller VMEM without touching vmem_limit_bytes."""
    tb = min(_round_up(batch, _SUBLANE), 512)

    def vmem_bytes(t):
        x_blk = t * in_dim * itemsize
        out_blk = 2 * t * out_pad * 4          # mu + exp(logvar), f32
        w_panel = in_dim * 2 * out_pad * itemsize
        y_tmp = t * 2 * out_pad * 4            # fused matmul result, f32
        return 2 * (x_blk + out_blk) + 2 * w_panel + y_tmp

    while tb > _SUBLANE and vmem_bytes(tb) > 24 * 1024 * 1024:
        tb = _round_up(tb // 2, _SUBLANE)
    return max(tb, _SUBLANE)


def feedforward_fused(x, w_fused, b_fused, out_dim, *, block_b=None):
    """x: [B, in_dim]. Returns (mu [B,out_dim], kl_loss scalar, exp(logvar))."""
    batch, in_dim = x.shape
    two_out_pad = w_fused.shape[1]
    out_pad = two_out_pad // 2
    compute_dtype = w_fused.dtype

    if block_b is None:
        block_b = _pick_block_b(batch, in_dim, out_pad,
                                jnp.dtype(compute_dtype).itemsize)
    else:
        block_b = max(_round_up(block_b, _SUBLANE), _SUBLANE)

    b_padded = _round_up(batch, block_b)
    nb = b_padded // block_b
    needs_mask = b_padded != batch

    x_p = x
    if needs_mask:
        x_p = jnp.pad(x, ((0, b_padded - batch), (0, 0)))
    x_p = x_p.astype(compute_dtype)           # bf16 halves x DMA; MXU accums f32

    inv_batch = 1.0 / float(batch)            # divide by TRUE batch, not tile

    def kernel(x_ref, w_ref, b_ref, mu_ref, kl_ref, elv_ref, kl_acc):
        pid = pl.program_id(0)

        @pl.when(pid == 0)
        def _init():
            kl_acc[0] = jnp.float32(0.0)

        # Single fused MXU pass: [TB, in] @ [in, 2*out_pad] -> f32.
        y = jnp.dot(x_ref[...], w_ref[...], preferred_element_type=jnp.float32)
        y = y + b_ref[...]

        mu = y[:, :out_pad]          # lane-aligned (multiple-of-128) slices
        logvar = y[:, out_pad:]
        exp_logvar = jnp.exp(logvar)

        mu_ref[...] = mu.astype(mu_ref.dtype)
        elv_ref[...] = exp_logvar.astype(elv_ref.dtype)

        # KL = mean_B( sum_dim( -(1 + lv - mu^2 - exp(lv)) / 2 ) ).
        # Zero-padded feature columns give (0 + 1 - 0 - 1)/2 = 0 -> no masking.
        kl_elem = (mu * mu + exp_logvar - logvar - 1.0) * 0.5
        if needs_mask:
            rows = pid * block_b + jax.lax.broadcasted_iota(
                jnp.int32, (block_b, 1), 0)
            kl_elem = jnp.where(rows < batch, kl_elem, 0.0)
        kl_acc[0] += jnp.sum(kl_elem)

        @pl.when(pid == nb - 1)
        def _finalize():
            kl_ref[...] = (kl_acc[0] * inv_batch).reshape(1, 1)

    mu_full, kl, elv_full = pl.pallas_call(
        kernel,
        out_shape=(
            jax.ShapeDtypeStruct((b_padded, out_pad), jnp.float32),
            jax.ShapeDtypeStruct((1, 1), jnp.float32),
            jax.ShapeDtypeStruct((b_padded, out_pad), jnp.float32),
        ),
        grid=(nb,),
        in_specs=[
            pl.BlockSpec((block_b, in_dim), lambda i: (i, 0)),
            pl.BlockSpec((in_dim, two_out_pad), lambda i: (0, 0)),
            pl.BlockSpec((1, two_out_pad), lambda i: (0, 0)),
        ],
        out_specs=(
            pl.BlockSpec((block_b, out_pad), lambda i: (i, 0)),
            pl.BlockSpec((1, 1), lambda i: (0, 0)),
            pl.BlockSpec((block_b, out_pad), lambda i: (i, 0)),
        ),
        scratch_shapes=[pltpu.SMEM((1,), jnp.float32)],
        compiler_params=pltpu.CompilerParams(
            # "arbitrary": KL running sum must visit batch tiles sequentially.
            dimension_semantics=("arbitrary",),
        ),
    )(x_p, w_fused, b_fused)

    return mu_full[:batch, :out_dim], kl[0, 0], elv_full[:batch, :out_dim]


def feedforward(x, w_mu, b_mu, w_logvar, b_logvar,
                *, compute_dtype=jnp.bfloat16, block_b=None):
    """Convenience wrapper (prefer prepare_params() once + feedforward_fused)."""
    w_fused, b_fused, out_dim = prepare_params(
        w_mu, b_mu, w_logvar, b_logvar, compute_dtype)
    return feedforward_fused(x, w_fused, b_fused, out_dim, block_b=block_b)


# TODO(synk): reparameterise() draws eps ~ N(0,1) (torch.randn_like) but its
# result `z` is never returned by forward(), so the sampling is omitted here.


if __name__ == "__main__":
    key = jax.random.PRNGKey(0)
    B, in_dim, out_dim = 20, 64, 20   # exercises batch padding/masking + lane padding

    k_x, k_wmu, k_bmu, k_wlv, k_blv = jax.random.split(key, 5)
    bound = 1.0 / jnp.sqrt(in_dim)

    x = jax.random.normal(k_x, (B, in_dim), dtype=jnp.float32)
    w_mu = jax.random.uniform(k_wmu, (out_dim, in_dim), minval=-bound, maxval=bound)
    b_mu = jax.random.uniform(k_bmu, (out_dim,), minval=-bound, maxval=bound)
    w_lv = jax.random.uniform(k_wlv, (out_dim, in_dim), minval=-bound, maxval=bound)
    b_lv = jax.random.uniform(k_blv, (out_dim,), minval=-bound, maxval=bound)

    # Hoist weight prep out of the per-call path (done once).
    w_fused, b_fused, _ = prepare_params(w_mu, b_mu, w_lv, b_lv)

    # block_b=8 -> grid=(3,), last tile partially masked (B=20, padded to 24).
    mu, kl_loss, exp_logvar = feedforward_fused(x, w_fused, b_fused, out_dim,
                                                block_b=8)
    jax.block_until_ready((mu, kl_loss, exp_logvar))

    # Reference in plain JAX using the same bf16 MXU inputs / f32 accumulation.
    xb = x.astype(jnp.bfloat16)
    mu_ref = jnp.dot(xb, w_mu.T.astype(jnp.bfloat16),
                     preferred_element_type=jnp.float32) + b_mu
    lv_ref = jnp.dot(xb, w_lv.T.astype(jnp.bfloat16),
                     preferred_element_type=jnp.float32) + b_lv
    kl_ref = jnp.mean(jnp.sum((mu_ref**2 + jnp.exp(lv_ref) - lv_ref - 1.0) * 0.5,
                              axis=1))

    assert mu.shape == (B, out_dim) and exp_logvar.shape == (B, out_dim)
    assert jnp.allclose(mu, mu_ref, atol=1e-2, rtol=1e-2), "mu mismatch"
    assert jnp.allclose(exp_logvar, jnp.exp(lv_ref), atol=1e-2, rtol=1e-2), \
        "exp(logvar) mismatch"
    assert jnp.allclose(kl_loss, kl_ref, atol=1e-2, rtol=1e-2), "kl mismatch"

    print("KERNEL_OK")
</pallas_src>

<mosaic_0001>
module attributes {stable_mosaic.version = 11 : i64} {
  func.func @kernel(%arg0: i32, %arg1: memref<8x64xbf16, #tpu.memory_space<vmem>>, %arg2: memref<64x256xbf16, #tpu.memory_space<vmem>>, %arg3: memref<1x256xf32, #tpu.memory_space<vmem>>, %arg4: memref<8x128xf32, #tpu.memory_space<vmem>>, %arg5: memref<1x1xf32, #tpu.memory_space<vmem>>, %arg6: memref<8x128xf32, #tpu.memory_space<vmem>>, %arg7: memref<1xf32, #tpu.memory_space<smem>>) attributes {dimension_semantics = [#tpu.dimension_semantics<arbitrary>], iteration_bounds = array<i64: 3>, scalar_prefetch = 0 : i64, scratch_operands = 1 : i64, tpu.core_type = #tpu.core_type<tc>, window_params = [{transform_indices = @transform_0, window_bounds = array<i64: 8, 64>}, {pipeline_mode = #tpu.pipeline_mode<synchronous>, transform_indices = @transform_1, window_bounds = array<i64: 64, 256>}, {pipeline_mode = #tpu.pipeline_mode<synchronous>, transform_indices = @transform_2, window_bounds = array<i64: 1, 256>}, {transform_indices = @transform_3, window_bounds = array<i64: 8, 128>}, {pipeline_mode = #tpu.pipeline_mode<synchronous>, transform_indices = @transform_4, window_bounds = array<i64: 1, 1>}, {transform_indices = @transform_5, window_bounds = array<i64: 8, 128>}]} {
    %c0_i32 = arith.constant 0 : i32
    %0 = arith.cmpi eq, %arg0, %c0_i32 : i32
    %1 = arith.extui %0 : i1 to i32
    %c0_i32_0 = arith.constant 0 : i32
    %2 = arith.cmpi ne, %1, %c0_i32_0 : i32
    scf.if %2 {
      %cst_17 = arith.constant 0.000000e+00 : f32
      %c0_18 = arith.constant 0 : index
      %41 = memref.load %arg7[%c0_18] : memref<1xf32, #tpu.memory_space<smem>>
      memref.store %cst_17, %arg7[%c0_18] : memref<1xf32, #tpu.memory_space<smem>>
    } else {
    }
    %c0 = arith.constant 0 : index
    %c0_1 = arith.constant 0 : index
    %3 = vector.load %arg1[%c0, %c0_1] : memref<8x64xbf16, #tpu.memory_space<vmem>>, vector<8x64xbf16>
    %c0_2 = arith.constant 0 : index
    %c0_3 = arith.constant 0 : index
    %4 = vector.load %arg2[%c0_2, %c0_3] : memref<64x256xbf16, #tpu.memory_space<vmem>>, vector<64x256xbf16>
    %cst = arith.constant dense<0.000000e+00> : vector<8x256xf32>
    %5 = tpu.matmul %3, %4, %cst {dimension_numbers = #tpu.dot_dimension_numbers<[1], [0], [0], [1], [0, 0, 1, 1], [], []>} : vector<8x64xbf16>, vector<64x256xbf16>, vector<8x256xf32> -> vector<8x256xf32>
    %c0_4 = arith.constant 0 : index
    %c0_5 = arith.constant 0 : index
    %6 = vector.load %arg3[%c0_4, %c0_5] : memref<1x256xf32, #tpu.memory_space<vmem>>, vector<1x256xf32>
    %7 = vector.broadcast %6 : vector<1x256xf32> to vector<8x256xf32>
    %8 = arith.addf %5, %7 : vector<8x256xf32>
    %9 = vector.extract_strided_slice %8 {offsets = [0, 0], sizes = [8, 128], strides = [1, 1]} : vector<8x256xf32> to vector<8x128xf32>
    %10 = vector.extract_strided_slice %8 {offsets = [0, 128], sizes = [8, 128], strides = [1, 1]} : vector<8x256xf32> to vector<8x128xf32>
    %11 = math.exp %10 : vector<8x128xf32>
    %c0_6 = arith.constant 0 : index
    %c0_7 = arith.constant 0 : index
    %12 = vector.load %arg4[%c0_6, %c0_7] : memref<8x128xf32, #tpu.memory_space<vmem>>, vector<8x128xf32>
    tpu.vector_store %arg4[%c0_6, %c0_7], %9 {strides = array<i32>} : memref<8x128xf32, #tpu.memory_space<vmem>>, vector<8x128xf32>,
    %c0_8 = arith.constant 0 : index
    %c0_9 = arith.constant 0 : index
    %13 = vector.load %arg6[%c0_8, %c0_9] : memref<8x128xf32, #tpu.memory_space<vmem>>, vector<8x128xf32>
    tpu.vector_store %arg6[%c0_8, %c0_9], %11 {strides = array<i32>} : memref<8x128xf32, #tpu.memory_space<vmem>>, vector<8x128xf32>,
    %14 = arith.mulf %9, %9 : vector<8x128xf32>
    %15 = arith.addf %14, %11 : vector<8x128xf32>
    %16 = arith.subf %15, %10 : vector<8x128xf32>
    %cst_10 = arith.constant 1.000000e+00 : f32
    %17 = vector.broadcast %cst_10 : f32 to vector<8x128xf32>
    %18 = arith.subf %16, %17 : vector<8x128xf32>
    %cst_11 = arith.constant 5.000000e-01 : f32
    %19 = vector.broadcast %cst_11 : f32 to vector<8x128xf32>
    %20 = arith.mulf %18, %19 : vector<8x128xf32>
    %c8_i32 = arith.constant 8 : i32
    %21 = arith.muli %arg0, %c8_i32 : i32
    %22 = tpu.iota {dimensions = array<i32: 0>} : vector<8x1xi32>
    %23 = vector.broadcast %21 : i32 to vector<8x1xi32>
    %24 = arith.addi %23, %22 : vector<8x1xi32>
    %c20_i32 = arith.constant 20 : i32
    %25 = vector.broadcast %c20_i32 : i32 to vector<8x1xi32>
    %26 = arith.cmpi slt, %24, %25 : vector<8x1xi32>
    %cst_12 = arith.constant 0.000000e+00 : f32
    %27 = vector.shape_cast %26 : vector<8x1xi1> to vector<8x1xi1>
    %28 = vector.broadcast %27 : vector<8x1xi1> to vector<8x128xi1>
    %29 = vector.broadcast %cst_12 : f32 to vector<8x128xf32>
    %30 = arith.select %28, %20, %29 : vector<8x128xi1>, vector<8x128xf32>
    %c0_13 = arith.constant 0 : index
    %31 = memref.load %arg7[%c0_13] : memref<1xf32, #tpu.memory_space<smem>>
    %32 = vector.shape_cast %30 : vector<8x128xf32> to vector<1x8x128xf32>
    %cst_14 = arith.constant dense<0.000000e+00> : vector<1xf32>
    %33 = vector.multi_reduction <add>, %32, %cst_14 [1, 2] : vector<1x8x128xf32> to vector<1xf32>
    %34 = vector.shape_cast %33 : vector<1xf32> to vector<1x1x1xf32>
    %35 = vector.extract %34[0, 0, 0] : f32 from vector<1x1x1xf32>
    %36 = arith.addf %31, %35 : f32
    %c0_15 = arith.constant 0 : index
    %37 = memref.load %arg7[%c0_15] : memref<1xf32, #tpu.memory_space<smem>>
    memref.store %36, %arg7[%c0_15] : memref<1xf32, #tpu.memory_space<smem>>
    %c2_i32 = arith.constant 2 : i32
    %38 = arith.cmpi eq, %arg0, %c2_i32 : i32
    %39 = arith.extui %38 : i1 to i32
    %c0_i32_16 = arith.constant 0 : i32
    %40 = arith.cmpi ne, %39, %c0_i32_16 : i32
    scf.if %40 {
      %c0_17 = arith.constant 0 : index
      %41 = memref.load %arg7[%c0_17] : memref<1xf32, #tpu.memory_space<smem>>
      %cst_18 = arith.constant 5.000000e-02 : f32
      %42 = arith.mulf %41, %cst_18 : f32
      %43 = vector.broadcast %42 : f32 to vector<1x1xf32>
      %c0_19 = arith.constant 0 : index
      %c0_20 = arith.constant 0 : index
      %44 = vector.load %arg5[%c0_19, %c0_20] : memref<1x1xf32, #tpu.memory_space<vmem>>, vector<1x1xf32>
      tpu.vector_store %arg5[%c0_19, %c0_20], %43 {strides = array<i32>} : memref<1x1xf32, #tpu.memory_space<vmem>>, vector<1x1xf32>,
    } else {
    }
    return
  }
  func.func @transform_0(%arg0: i32) -> (i32, i32) {
    %c0_i32 = arith.constant 0 : i32
    %c0_i32_0 = arith.constant 0 : i32
    return %arg0, %c0_i32 : i32, i32
  }
  func.func @transform_1(%arg0: i32) -> (i32, i32) {
    %c0_i32 = arith.constant 0 : i32
    %c0_i32_0 = arith.constant 0 : i32
    %c0_i32_1 = arith.constant 0 : i32
    return %c0_i32, %c0_i32_0 : i32, i32
  }
  func.func @transform_2(%arg0: i32) -> (i32, i32) {
    %c0_i32 = arith.constant 0 : i32
    %c0_i32_0 = arith.constant 0 : i32
    %c0_i32_1 = arith.constant 0 : i32
    return %c0_i32, %c0_i32_0 : i32, i32
  }
  func.func @transform_3(%arg0: i32) -> (i32, i32) {
    %c0_i32 = arith.constant 0 : i32
    %c0_i32_0 = arith.constant 0 : i32
    return %arg0, %c0_i32 : i32, i32
  }
  func.func @transform_4(%arg0: i32) -> (i32, i32) {
    %c0_i32 = arith.constant 0 : i32
    %c0_i32_0 = arith.constant 0 : i32
    %c0_i32_1 = arith.constant 0 : i32
    return %c0_i32, %c0_i32_0 : i32, i32
  }
  func.func @transform_5(%arg0: i32) -> (i32, i32) {
    %c0_i32 = arith.constant 0 : i32
    %c0_i32_0 = arith.constant 0 : i32
    return %arg0, %c0_i32 : i32, i32
  }
}

</mosaic_0001>

<bundles_post_ra>
// kernel: tpu_custom_call.1
= control target key start
LH: loop header
LB: loop body
LE: loop exit
PB: predicated region body
PF: predicated region fallthrough
CT: control target
= control target key end

     0   :  { %11 = vsyncpa [#allocation4], 0  ;;  %s1186_s0 = inlined_call_operand.hbm [shape: bf16[24,64], index: 0, kind: input, shape index: {}]   ;;  %s1187_s1 = inlined_call_operand.hbm [shape: bf16[64,256], index: 1, kind: input, shape index: {}]   ;;  %s1188_s2 = inlined_call_operand.vmem [shape: f32[1,256], index: 2, kind: input, shape index: {}]   ;;  %s1189_s3 = inlined_call_operand.hbm [shape: f32[24,128], index: 3, kind: output, shape index: {0}]   ;;  %s1190_s4 = inlined_call_operand.hbm [shape: f32[1,1], index: 4, kind: output, shape index: {1}]   ;;  %s1191_s5 = inlined_call_operand.hbm [shape: f32[24,128], index: 5, kind: output, shape index: {2}]  }
   0x1   :  { %13 = vsyncpa [#allocation4 + $0x1], 0 }
   0x2   :  { %14 = vsyncpa [#allocation7], 0 }
   0x3   :  { %15 = vsyncpa [#allocation5], 0 }
   0x4   :  { %17 = vsyncpa [#allocation5 + $0x1], 0 }
   0x5   :  { %18 = vsyncpa [#allocation10], 0  ;;  %s928_s18 = smov 0   ;;  %s930_s19 = smov 0  }
   0x6   :  { %s932_s20 = smov 0   ;;  %s934_s21 = smov 0  }
   0x7 LB: > { %s947_s22 = sadd.s32 4294967295, %s887_s21   ;;  %s577_s23 = sadd.s32 4294967294, %s887_s21   ;;  %s887_s21 = sphi %s934_s21, %s1216_s21   ;;  %s883_s20 = sphi %s932_s20, %s1215_s20   ;;  %s879_s19 = sphi %s930_s19, %s1214_s19   ;;  %s875_s18 = sphi %s928_s18, %s1213_s18  }
   0x8   : > { %p44_p0 = scmp.ne.s32.totalorder %s879_s19, %s875_s18  ;;  %p1192_p1 = scmp.eq.s32.totalorder %s947_s22, 0 }
   0x9   : > { %p116_p3 = scmp.eq.s32.totalorder %s577_s23, 2  ;;  %p578_p5 = scmp.ge.s32.totalorder %s887_s21, 1 }
   0xa   : > { %p957_p4 = por %p1192_p1, %p44_p0  ;;  %p170_p7 = scmp.lt.s32.totalorder %s887_s21, 4 }
   0xb   : > { %p962_p6 = por %p116_p3, %p44_p0  ;;  %s889_s27 = smov [#allocation6]  }
   0xc   : > { %s1195_s24 = scalar_select %p957_p4, 1, 0 }
   0xd   : > { %s1196_s25 = scalar_select %p962_p6, 1, 0 }
   0xe   : > { %p967_p8 = pnand %p578_p5, %p170_p7  ;;  %s182_s28 = sshll.u32 %s889_s27, 4  ;;  %s183_s28 = int_to_ptr.vmem [resolvable:$true] %s182_s28 }
   0xf   : > { %s980_s30 = sadd.s32 1, %s887_s21   ;;  %s31_s6 = sadd.s32 1, %s883_s20 }
  0x10   : > { %s1197_s26 = scalar_select %p967_p8, 1, 0 }
  0x11   : > { %p627_p9 = pneg %p967_p8  ;;  %s28_s7 = ssub.s32 %s887_s21, %s980_s30 }
  0x12   : > { %s701_s10 = scalar_lea.hbm %s1187_s1, 1024 }
  0x13   : > { %p975_p10 = pnand %p627_p9, %p1192_p1  ;;  %p702_p11 = scmp.ne.s32.totalorder %s1187_s1, %s701_s10 }
  0x14   : > { %p708_p3 = scmp.lt.u32.totalorder %s701_s10, %s1187_s1 }
  0x15   : > { %p703_p12 = pneg %p975_p10 }
  0x17   : > { %p704_p13 = pnand %p703_p12, %p702_p11 }
  0x19   : > { %p705_p0 = pneg %p704_p13 }
  0x1b   : > { %p710_p5 = pnand %p708_p3, %p705_p0 }
  0x1d   : > { %713 = shalt.err (!%p710_p5)
}
  0x1e   : > { %s714_s15 = scalar_lea.vmem %s183_s28, 1024  ;;  %p722_p2 = scmp.lt.s32.totalorder %s183_s28, %s183_s28 }
  0x1f   : > { %p715_p7 = scmp.ne.s32.totalorder %s183_s28, %s714_s15  ;;  %p723_p6 = scmp.lt.s32.totalorder %s714_s15, %s714_s15 }
  0x21   : > { %p717_p9 = pnand %p715_p7, %p703_p12  ;;  %p724_p4 = por %p723_p6, %p722_p2 }
  0x23   : > { %p718_p1 = pneg %p717_p9 }
  0x25   : > { %p725_p8 = pnand %p724_p4, %p718_p1 }
  0x27   : > { %728 = shalt.err (!%p725_p8)
}
  0x28   : > { %s890_s16 = smov 128   ;;  %s891_s17 = smov 8  }
  0x29   : > { %630 = dma.hbm_to_vmem [thread:$0]  (!%p975_p10), %s1187_s1, 1024, %s183_s28, [#allocation7], %s890_s16, %s890_s16, %s891_s17  }
  0x2a   : > { %p29_p11 = scmp.eq.s32.totalorder %s28_s7, 0  ;;  %p38_p2 = scmp.ne.s32.totalorder %s883_s20, %s879_s19 }
  0x2b   : > { %p39_p1 = scmp.eq.s32.totalorder %s887_s21, 0  ;;  %p643_p4 = scmp.lt.s32.totalorder %s887_s21, 3 }
  0x2c   : > { %s1006_s8 = scalar_select %p29_p11, %s883_s20, %s31_s6  }
  0x2d   : > { %p40_p6 = por %p39_p1, %p38_p2  ;;  %p1199_p8 = scmp.eq.s32.totalorder %s947_s22, 2 }
  0x2e   : > { %s199_s10 = sand.u32 1, %s883_s20   ;;  %s582_s11 = sshll.u32 %s887_s21, 6 }
  0x2f   : > { %p1010_p12 = por %p1199_p8, %p38_p2  ;;  %s581_s12 = sshll.u32 %s199_s10, 2 }
  0x30   : > { %s1019_s14 = scalar_lea.hbm %s1186_s0, %s582_s11  ;;  %s203_s28 = scalar_lea.vmem [#allocation3], %s581_s12 }
  0x31   : > { %s210_s6 = sshll.u32 %s203_s28, 4  ;;  %p1021_p10 = pnand %p643_p4, %p40_p6  ;;  %s1025_s6 = int_to_ptr.vmem [resolvable:$true] %s210_s6 }
  0x32   : > { %s200_s15 = scalar_lea.sflag [#allocation4], %s199_s10  ;;  %s729_s16 = scalar_lea.hbm %s1019_s14, 64 }
  0x33   : > { %p730_p13 = scmp.ne.s32.totalorder %s1019_s14, %s729_s16  ;;  %p731_p0 = pneg %p1021_p10 }
  0x34   : > { %s734_s27 = scalar_lea.hbm %s1186_s0, 192  ;;  %p735_p7 = scmp.lt.u32.totalorder %s1019_s14, %s1186_s0 }
  0x35   : > { %p732_p3 = pnand %p731_p0, %p730_p13  ;;  %p736_p9 = scmp.lt.u32.totalorder %s734_s27, %s729_s16 }
  0x36   : > { %p738_p2 = scmp.lt.u32.totalorder %s729_s16, %s1019_s14 }
  0x37   : > { %p733_p5 = pneg %p732_p3  ;;  %p737_p11 = por %p736_p9, %p735_p7 }
  0x39   : > { %p739_p1 = por %p738_p2, %p737_p11 }
  0x3b   : > { %p740_p4 = pnand %p739_p1, %p733_p5 }
  0x3d   : > { %743 = shalt.err (!%p740_p4)
}
  0x3e   : > { %s744_s10 = scalar_lea.vmem %s1025_s6, 64  ;;  %s892_s29 = smov [#allocation3]  }
  0x3f   : > { %p745_p6 = scmp.ne.s32.totalorder %s1025_s6, %s744_s10  ;;  %s749_s13 = sshll.u32 %s892_s29, 4  ;;  %s750_s13 = int_to_ptr.vmem [resolvable:$false] %s749_s13 }
  0x40   : > { %s751_s28 = scalar_lea.vmem %s750_s13, 128  ;;  %p752_p3 = scmp.lt.s32.totalorder %s1025_s6, %s750_s13 }
  0x41   : > { %p747_p8 = pnand %p745_p6, %p731_p0  ;;  %p753_p7 = scmp.lt.s32.totalorder %s751_s28, %s744_s10 }
  0x43   : > { %p748_p13 = pneg %p747_p8  ;;  %p754_p9 = por %p753_p7, %p752_p3 }
  0x45   : > { %p755_p11 = pnand %p754_p9, %p748_p13 }
  0x47   : > { %758 = shalt.err (!%p755_p11)
}
  0x48   : > { %634 = dma.hbm_to_vmem [thread:$0]  (!%p1021_p10), %s1019_s14, 64, %s1025_s6, %s200_s15  }
  0x49   : > { %p1202_p5 = scmp.ne.s32.totalorder %s1197_s26, 0 }
  0x4a   : > { %s1055_s16 = sand.u32 (!%p1202_p5), 1, %s879_s19   ;;  %p1203_p0 = scmp.ne.s32.totalorder (!%p1202_p5), %s1195_s24, 0 }
  0x4b   : > { %219 = sbr.rel (%p1202_p5) target bundleno = 632 (0x278), region = 32  ;;  %s584_s17 = sshll.u32 (!%p1202_p5), %s1055_s16, 2 }
  0x4c   : > { %s222_s18 = scalar_lea.sflag (!%p1202_p5), [#allocation4], %s1055_s16  ;;  %s225_s27 = scalar_lea.vmem (!%p1202_p5), [#allocation3], %s584_s17 }
  0x52   : > { %858 = dma.done.wait (%p1203_p0), %s222_s18, 64  }
  0x53   : > { %860 = vsyncadd (%p1203_p0), %s222_s18, 4294967232  ;;  %p1204_p2 = scmp.eq.s32.totalorder %s947_s22, 0 }
  0x55   : > { %862 = dma.done.wait (%p1204_p2), [#allocation7], 1024   ;;  %p1205_p10 = pmov %p1204_p2 }
  0x56   : > { %v893_v0 = vmov 0   ;;  %v687_v1 = vld [vmem:[#allocation6 + $0x4] ss:$8 sps:$4 sm:$0xff]   ;;  %v689_v2 = vld [vmem:[#allocation6] ss:$8 sps:$4 sm:$0xff]   ;;  %vm329_vm0 = vcmask 523264   ;;  %v279_v10 = vlaneseq  ;;  %p1206_p1 = pmov %p1204_p2 }
  0x57   : > { %864 = vsyncadd (%p1205_p10), [#allocation7], 4294966272  ;;  %365 = vmatprep.mubr.bf16.mxu0 %v893_v0  ;;  %333 = vmatprep.subr.bf16.mxu0 %v687_v1  ;;  %v690_v3 = vld [vmem:[#allocation6 + $0x14] ss:$8 sps:$4 sm:$0xff]   ;;  %v692_v4 = vld [vmem:[#allocation6 + $0x10] ss:$8 sps:$4 sm:$0xff]  }
  0x58   : > { %334 = vmatpush1.bf16.msra.mxu0 %v689_v2  ;;  %v693_v5 = vld [vmem:[#allocation6 + $0x24] ss:$8 sps:$4 sm:$0xff]   ;;  %v695_v6 = vld [vmem:[#allocation6 + $0x20] ss:$8 sps:$4 sm:$0xff]   ;;  %v696_v7 = vld [vmem:[#allocation6 + $0x34] ss:$8 sps:$4 sm:$0xff]  }
  0x59   : > { %335 = vmatprep.subr.bf16.mxu0 %v690_v3  ;;  %v698_v8 = vld [vmem:[#allocation6 + $0x30] ss:$8 sps:$4 sm:$0xff]   ;;  %v280_v11 = vshrl.u32 %v279_v10, 7  ;;  %s586_s14 = sshll.u32 %s1055_s16, 3  ;;  %s599_s7 = sshll.u32 %s947_s22, 3 }
  0x5a   : > { %v268_v9 = vld [vmem:[%s225_s27] sm:$0xf]  ;;  %s1071_s6 = scalar_lea.vmem [#allocation8], %s586_s14  ;;  %v386_v25 = vstv %s599_s7  ;;  %s1075_s15 = scalar_lea.vmem [#allocation11], %s586_s14 }
  0x5b   : > { %v281_v12 = vsub.s32 0, %v280_v11  ;;  %v277_v13 = vld [vmem:[%s1188_s2] sm:$0x3]  ;;  %v285_v14 = vsub.s32 1, %v280_v11  ;;  %v387_v28 = vadd.s32 %v386_v25, %v280_v11  ;;  %s894_s11 = smov 0.0   ;;  %p600_p4 = scmp.ne.s32.totalorder %s947_s22, 2 }
  0x5c   : > { %336 = vmatpush1.bf16.msra.mxu0 %v692_v4  ;;  %618 = sst [smem:[#allocation2]] (%p1206_p1), %s894_s11  ;;  %vm412_vm2 = vcmask (!%p600_p4), 0  }
  0x5d   : > { %337 = vmatprep.subr.bf16.mxu0 %v693_v5  ;;  %v282_v15 = vrot.slane %v277_v13, %v281_v12  ;;  %v286_v16 = vrot.slane %v277_v13, %v285_v14  ;;  %vm388_vm1 = vcmp.lt.s32.totalorder %v387_v28, 20  ;;  %s392_s12 = sld [smem:[#allocation2]] }
  0x60   : > { %338 = vmatpush1.bf16.msra.mxu0 %v695_v6 }
  0x61   : > { %339 = vmatprep.subr.bf16.mxu0 %v696_v7 }
  0x64   : > { %340 = vmatpush1.bf16.msra.mxu0 %v698_v8 }
  0x67   : > { %597 = vmatmul.mubr.msk.bf16.vlgmr.msra.gmra.mrb[0].mxu0 %vm329_vm0, %v268_v9 }
 0x13a   : > { %v367_v17 = vpop.f32.mrb[0].mxu0 }
 0x13b   : > { %v368_v18 = vadd.f32 %v367_v17, %v282_v15  ;;  %v369_v19 = vpop.f32.mrb[1].mxu0 }
 0x13c   : > { %v370_v20 = vadd.f32 %v369_v19, %v286_v16  ;;  %v371_v21 = vpop.f32.mrb[2].mxu0 }
 0x13d   : > { %376 = vst [vmem:[%s1071_s6] sm:$0xff] %v368_v18  ;;  %v372_v22 = vpop.f32.mrb[3].mxu0  ;;  %v378_v24 = vmul.f32 %v368_v18, %v368_v18 }
 0x13e   : > { %v374_v23 = vmul.f32 1.442695, %v370_v20 }
 0x140   : > { %699 = vpow2.f32 %v374_v23 }
 0x14a   : > { %v700_v26 = vpop.eup %699 }
 0x14b   : > { %377 = vst [vmem:[%s1075_s15] sm:$0xff] %v700_v26  ;;  %v379_v27 = vadd.f32 %v700_v26, %v378_v24 }
 0x14d   : > { %v380_v29 = vsub.f32 %v379_v27, %v370_v20 }
 0x14f   : > { %v598_v30 = vadd.f32 -1.0, %v380_v29 }
 0x151   : > { %v382_v31 = vmul.f32 0.5, %v598_v30 }
 0x153   : > { %v391_v32 = vsel %vm388_vm1, %v382_v31, 0.0 }
 0x154   : > { %393 = vadd.xlane.f32.xlu0 %v391_v32 }
 0x1e1   : > { %v394_v33 = vpop.xlane.xlu0 %393 }
 0x1e2   : > { %v395_v34 = vrot.slane %v394_v33, 4 }
 0x1e4   : > { %v396_v35 = vadd.f32 %v395_v34, %v394_v33 }
 0x1e6   : > { %v397_v36 = vrot.slane %v396_v35, 2 }
 0x1e8   : > { %v398_v37 = vadd.f32 %v397_v36, %v396_v35 }
 0x1ea   : > { %v399_v38 = vrot.slane %v398_v37, 1 }
 0x1ec   : > { %v400_v39 = vadd.f32 %v399_v38, %v398_v37 }
 0x1ee   : > { %609 = vpush %v400_v39 }
 0x21c   : > { %408 = sbr.rel (%p600_p4) target bundleno = 557 (0x22d), region = 48 }
 0x21f   : > { %s610_s10 = spop %609 }
 0x220   : > { %s402_s29 = sadd.f32 %s610_s10, %s392_s12 }
 0x222   : > { %404 = sst [smem:[#allocation2]] %s402_s29 }
 0x223   : > { %s409_s13 = sld [smem:[#allocation2]] }
 0x229   : > { %s410_s28 = smul.f32 0.05, %s409_s13 }
 0x22b   : > { %v411_v40 = vstv %s410_s28 }
 0x22c   : > { %413 = vst.msk [vmem:[#allocation9] sm:$0x1] %vm412_vm2, %v411_v40 }
 0x22d PF: > { %s414_s16 = sand.u32 1, %s947_s22   ;;  %s603_s17 = sshll.u32 %s947_s22, 7 }
 0x22e   : > { %s1088_s24 = scalar_lea.hbm %s1189_s3, %s603_s17  ;;  %s433_s26 = sshll.u32 %s1071_s6, 4  ;;  %s1091_s26 = int_to_ptr.vmem [resolvable:$true] %s433_s26 }
 0x22f   : > { %s895_s14 = smov [#allocation9]   ;;  %s1095_s11 = scalar_lea.sflag [#allocation5], %s414_s16 }
 0x230   : > { %s1093_s7 = sshll.u32 %s895_s14, 4  ;;  %s759_s12 = scalar_lea.vmem %s1091_s26, 128  ;;  %s445_s7 = int_to_ptr.vmem [resolvable:$true] %s1093_s7 }
 0x231   : > { %p760_p6 = scmp.ne.s32.totalorder %s1091_s26, %s759_s12  ;;  %s896_s10 = smov [#allocation8]  }
 0x232   : > { %s763_s29 = sshll.u32 %s896_s10, 4  ;;  %s764_s29 = int_to_ptr.vmem [resolvable:$false] %s763_s29 }
 0x233   : > { %p761_p8 = pnand %p760_p6, %p1010_p12  ;;  %s765_s13 = scalar_lea.vmem %s764_s29, 256 }
 0x234   : > { %p766_p3 = scmp.lt.s32.totalorder %s1091_s26, %s764_s29  ;;  %p767_p7 = scmp.lt.s32.totalorder %s765_s13, %s759_s12 }
 0x235   : > { %p762_p13 = pneg %p761_p8 }
 0x236   : > { %p768_p9 = por %p767_p7, %p766_p3 }
 0x238   : > { %p769_p11 = pnand %p768_p9, %p762_p13 }
 0x23a   : > { %772 = shalt.err (!%p769_p11)
}
 0x23b   : > { %s773_s6 = scalar_lea.hbm %s1088_s24, 128  ;;  %s777_s18 = scalar_lea.hbm %s1189_s3, 384 }
 0x23c   : > { %p774_p5 = scmp.ne.s32.totalorder %s1088_s24, %s773_s6  ;;  %p778_p10 = scmp.lt.u32.totalorder %s1088_s24, %s1189_s3 }
 0x23d   : > { %p779_p1 = scmp.lt.u32.totalorder %s777_s18, %s773_s6  ;;  %p781_p6 = scmp.lt.u32.totalorder %s773_s6, %s1088_s24 }
 0x23e   : > { %p775_p0 = pnand %p774_p5, %p1010_p12 }
 0x23f   : > { %p780_p4 = por %p779_p1, %p778_p10 }
 0x240   : > { %p776_p2 = pneg %p775_p0 }
 0x241   : > { %p782_p8 = por %p781_p6, %p780_p4 }
 0x243   : > { %p783_p13 = pnand %p782_p8, %p776_p2 }
 0x245   : > { %786 = shalt.err (!%p783_p13)
}
 0x246   : > { %619 = dma.vmem_to_hbm [thread:$0]  (%p1010_p12), %s1091_s26, 128, %s1088_s24, %s1095_s11  }
 0x247   : > { %s1125_s29 = scalar_lea.hbm %s1191_s5, %s603_s17  ;;  %s787_s13 = scalar_lea.vmem %s445_s7, 16 }
 0x248   : > { %p788_p3 = scmp.ne.s32.totalorder %s445_s7, %s787_s13  ;;  %p1207_p7 = scmp.eq.s32.totalorder %s947_s22, 2 }
 0x249   : > { %s793_s6 = scalar_lea.vmem %s445_s7, 32  ;;  %p794_p5 = scmp.lt.s32.totalorder %s445_s7, %s445_s7 }
 0x24a   : > { %p789_p9 = pnand %p788_p3, %p1207_p7  ;;  %p795_p0 = scmp.lt.s32.totalorder %s793_s6, %s787_s13 }
 0x24c   : > { %p790_p11 = pneg %p789_p9  ;;  %p796_p2 = por %p795_p0, %p794_p5 }
 0x24e   : > { %p797_p10 = pnand %p796_p2, %p790_p11 }
 0x250   : > { %800 = shalt.err (!%p797_p10)
}
 0x251   : > { %s801_s26 = scalar_lea.hbm %s1190_s4, 16  ;;  %p1208_p4 = pmov %p1207_p7 }
 0x252   : > { %p802_p1 = scmp.ne.s32.totalorder %s1190_s4, %s801_s26  ;;  %p807_p13 = scmp.lt.u32.totalorder %s801_s26, %s1190_s4 }
 0x254   : > { %p803_p6 = pnand %p802_p1, %p1208_p4 }
 0x256   : > { %p804_p8 = pneg %p803_p6 }
 0x258   : > { %p809_p3 = pnand %p807_p13, %p804_p8 }
 0x25a   : > { %812 = shalt.err (!%p809_p3)
}
 0x25b   : > { %p1209_p7 = pmov %p1208_p4  ;;  %s457_s10 = sshll.u32 %s1075_s15, 4  ;;  %s458_s10 = int_to_ptr.vmem [resolvable:$true] %s457_s10 }
 0x25c   : > { %s813_s13 = scalar_lea.vmem %s458_s10, 128  ;;  %s897_s6 = smov [#allocation11]  }
 0x25d   : > { %621 = dma.vmem_to_hbm [thread:$0]  (%p1209_p7), %s445_s7, 16, %s1190_s4, [#allocation10]  }
 0x25e   : > { %p814_p9 = scmp.ne.s32.totalorder %s458_s10, %s813_s13  ;;  %s817_s28 = sshll.u32 %s897_s6, 4  ;;  %s818_s28 = int_to_ptr.vmem [resolvable:$false] %s817_s28 }
 0x25f   : > { %s819_s24 = scalar_lea.vmem %s818_s28, 256  ;;  %p820_p0 = scmp.lt.s32.totalorder %s458_s10, %s818_s28 }
 0x260   : > { %p815_p11 = pnand %p814_p9, %p1010_p12  ;;  %p821_p2 = scmp.lt.s32.totalorder %s819_s24, %s813_s13 }
 0x262   : > { %p816_p5 = pneg %p815_p11  ;;  %p822_p10 = por %p821_p2, %p820_p0 }
 0x264   : > { %p823_p1 = pnand %p822_p10, %p816_p5 }
 0x266   : > { %826 = shalt.err (!%p823_p1)
}
 0x267   : > { %s827_s15 = scalar_lea.hbm %s1125_s29, 128  ;;  %s831_s16 = scalar_lea.hbm %s1191_s5, 384 }
 0x268   : > { %p828_p4 = scmp.ne.s32.totalorder %s1125_s29, %s827_s15  ;;  %p832_p13 = scmp.lt.u32.totalorder %s1125_s29, %s1191_s5 }
 0x269   : > { %p833_p3 = scmp.lt.u32.totalorder %s831_s16, %s827_s15  ;;  %p835_p9 = scmp.lt.u32.totalorder %s827_s15, %s1125_s29 }
 0x26a   : > { %p829_p6 = pnand %p828_p4, %p1010_p12 }
 0x26b   : > { %p834_p7 = por %p833_p3, %p832_p13 }
 0x26c   : > { %p830_p8 = pneg %p829_p6 }
 0x26d   : > { %p836_p11 = por %p835_p9, %p834_p7 }
 0x26f   : > { %p837_p5 = pnand %p836_p11, %p830_p8 }
 0x271   : > { %840 = shalt.err (!%p837_p5)
}
 0x272   : > { %622 = dma.vmem_to_hbm [thread:$0]  (%p1010_p12), %s458_s10, 128, %s1125_s29, %s1095_s11  }
 0x273   : > { %p1210_p0 = scmp.eq.s32.totalorder %s947_s22, 2 }
 0x275   : > { %866 = dma.done.wait (%p1210_p0), [#allocation10], 16   ;;  %p1211_p2 = pmov %p1210_p0 }
 0x277   : > { %868 = vsyncadd (%p1211_p2), [#allocation10], 4294967280 }
 0x278 PF: > { %p648_p10 = scmp.ge.s32.totalorder %s887_s21, 2  ;;  %s473_s27 = sand.u32 1, %s577_s23  }
 0x279   : > { %p1212_p1 = scmp.ne.s32.totalorder %s1196_s25, 0  ;;  %s474_s14 = scalar_lea.sflag [#allocation5], %s473_s27 }
 0x27b   : > { %p636_p4 = pnand %p648_p10, %p1212_p1 }
 0x27d   : > { %870 = dma.done.wait (!%p636_p4), %s474_s14, 256  }
 0x27e   : > { %872 = vsyncadd (!%p636_p4), %s474_s14, 4294967040  ;;  %p21_p12 = scmp.ge.s32.totalorder %s980_s30, 5   ;;  %s1213_s18 = smov %s879_s19 }
 0x27f   : > { %s1214_s19 = smov %s883_s20  ;;  %s1215_s20 = smov %s1006_s8 }
 0x280   : > { %s1216_s21 = smov %s980_s30  ;;  %23 = sbr.rel (!%p21_p12) target bundleno = 7 (0x7), region = 114 }
 0x287   :  { %488 = vsyncpa [#allocation4], 1 }
 0x288   :  { %490 = vsyncpa [#allocation4 + $0x1], 1 }
 0x289   :  { %491 = vsyncpa [#allocation7], 1 }
 0x28a   :  { %492 = vsyncpa [#allocation5], 1 }
 0x28b   :  { %494 = vsyncpa [#allocation5 + $0x1], 1 }
 0x28c   :  { %495 = vsyncpa [#allocation10], 1 }

</bundles_post_ra>
